<compile_context>
chip_gen: v5e
topology: v5e:2x2
jax: 0.10.0
libtpu: 0.0.40
codegen_flags: <defaults>
</compile_context>

<pallas_src>
import functools

import jax
import jax.numpy as jnp
from jax.experimental import pallas as pl
from jax.experimental.pallas import tpu as pltpu


def _scse_kernel(x_ref, w1t_ref, w2t_ref, ws_ref, o_ref, *, inv_hw):
    # x block: (1, Bt, C, HWp) -> (Bt, C, HWp), native dtype (f32 or bf16)
    x = x_ref[0]

    # ---- cSE: global average pool + two bias-free 1x1 convs (tiny, f32) ----
    # Sum accumulates in f32 without materializing a full f32 copy of x.
    means = jnp.sum(x, axis=-1, dtype=jnp.float32) * inv_hw              # (Bt, C)
    h = jnp.dot(means, w1t_ref[...], preferred_element_type=jnp.float32)  # (Bt, Cr)
    zc = jnp.dot(h, w2t_ref[...], preferred_element_type=jnp.float32)     # (Bt, C)
    gc = jax.nn.sigmoid(zc)                                               # (Bt, C)

    # ---- sSE: bias-free 1x1 conv C->1, all Bt images in one batched matmul ----
    # ws_ref is (Bt, 1, C) in x's dtype -> bf16 MXU path when x/out are bf16.
    qs = jax.nn.sigmoid(
        jnp.einsum('brc,bch->brh', ws_ref[...], x,
                   preferred_element_type=jnp.float32))                   # (Bt, 1, HWp)

    # ---- excite: U*sigmoid(z_c) + U*sigmoid(q_s) == U*(gc + qs) ----
    # Gate broadcast is pure VPU (sublane + lane broadcasts), no MXU replication.
    gate = qs + gc[:, :, None]                                            # (Bt, C, HWp) f32
    o_ref[0] = (x * gate.astype(x.dtype)).astype(o_ref.dtype)


def _vmem_limits():
    """(vmem_limit_bytes for the compiler, block-sizing budget)."""
    try:
        cap = int(pltpu.get_tpu_info().vmem_capacity_bytes)
    except Exception:
        cap = 64 * 1024 * 1024  # conservative default (v7x per-core VMEM)
    # Leave headroom for compiler-internal scratch: ~48 MiB on v7x, ~96 MiB on
    # the 128 MiB parts.
    vmem_limit = min((cap * 3) // 4, 96 * 1024 * 1024)
    block_budget = (vmem_limit * 3) // 5
    return vmem_limit, block_budget


def _pick_block_batch(B, C, HWp, in_itemsize, out_itemsize, budget):
    """Largest Bt dividing B whose estimated VMEM footprint fits the budget.

    Counts 2x double-buffered input + 2x double-buffered output blocks plus the
    in-kernel f32 gate temp (+ slack), and a fixed 1 MiB for weights/overheads.
    """
    best = 1
    for bt in range(1, B + 1):
        if B % bt:
            continue
        block_elems = bt * C * HWp
        est = block_elems * (2 * in_itemsize + 2 * out_itemsize + 8) + (1 << 20)
        if est <= budget:
            best = bt
    return best


def scse_forward(x_nchw, w1, w2, ws, *, block_batch=None):
    """scSE forward.

    x_nchw: (B, C, H, W)
    w1: (C//2, C)  Conv_Squeeze weight    (1x1, no bias)
    w2: (C, C//2)  Conv_Excitation weight (1x1, no bias)
    ws: (C,)       sSE Conv1x1 weight     (1x1, C->1, no bias)
    """
    B, C, H, W = x_nchw.shape
    Cr = w1.shape[0]
    HW = H * W
    HWp = ((HW + 127) // 128) * 128  # lane-dense (128-aligned) last dim

    vmem_limit, block_budget = _vmem_limits()
    itemsize = jnp.dtype(x_nchw.dtype).itemsize
    Bt = (block_batch if block_batch is not None
          else _pick_block_batch(B, C, HWp, itemsize, itemsize, block_budget))
    assert B % Bt == 0
    G = B // Bt

    # Fold batch groups onto a leading block axis (pure metadata reshape) and
    # pad the spatial axis to a multiple of 128 (zeros; mean uses true HW).
    x3 = x_nchw.reshape(B, C, HW)
    if HWp != HW:
        x3 = jnp.pad(x3, ((0, 0), (0, 0), (0, HWp - HW)))
    x4 = x3.reshape(G, Bt, C, HWp)

    # cSE weights stay f32 (their matmuls are tiny); the sSE weight follows the
    # input dtype so the HW-wide matmul uses the fast bf16 MXU path for bf16 I/O.
    w1t = jnp.asarray(w1, jnp.float32).T                                  # (C, Cr)
    w2t = jnp.asarray(w2, jnp.float32).T                                  # (Cr, C)
    ws3 = jnp.broadcast_to(
        jnp.asarray(ws, x_nchw.dtype).reshape(1, 1, C), (Bt, 1, C))       # (Bt, 1, C)

    kernel = functools.partial(_scse_kernel, inv_hw=1.0 / HW)
    out = pl.pallas_call(
        kernel,
        out_shape=jax.ShapeDtypeStruct((G, Bt, C, HWp), x_nchw.dtype),
        grid_spec=pltpu.PrefetchScalarGridSpec(
            num_scalar_prefetch=0,
            grid=(G,),
            in_specs=[
                pl.BlockSpec((1, Bt, C, HWp), lambda g: (g, 0, 0, 0)),
                pl.BlockSpec((C, Cr), lambda g: (0, 0)),
                pl.BlockSpec((Cr, C), lambda g: (0, 0)),
                pl.BlockSpec((Bt, 1, C), lambda g: (0, 0, 0)),
            ],
            out_specs=pl.BlockSpec((1, Bt, C, HWp), lambda g: (g, 0, 0, 0)),
        ),
        compiler_params=pltpu.CompilerParams(
            dimension_semantics=("parallel",),
            vmem_limit_bytes=vmem_limit,
        ),
    )(x4, w1t, w2t, ws3)

    out = out.reshape(B, C, HWp)
    if HWp != HW:
        out = out[:, :, :HW]
    return out.reshape(B, C, H, W)


def scse_ref(x, w1, w2, ws):
    """Pure-JAX reference matching the PyTorch scSE forward."""
    hp = jax.lax.Precision.HIGHEST
    xf = x.astype(jnp.float32)
    # cSE
    z = xf.mean(axis=(2, 3), keepdims=True)                          # (B, C, 1, 1)
    z = jnp.einsum('rc,bcij->brij', w1, z, precision=hp)
    z = jnp.einsum('cr,brij->bcij', w2, z, precision=hp)
    u_cse = xf * jax.nn.sigmoid(z)
    # sSE
    q = jnp.einsum('c,bchw->bhw', ws, xf, precision=hp)[:, None]     # (B, 1, H, W)
    u_sse = xf * jax.nn.sigmoid(q)
    return u_cse + u_sse


if __name__ == "__main__":
    # scSE(in_channels=4): Conv_Squeeze 4->2, Conv_Excitation 2->4, sSE conv 4->1
    B, C, H, W = 2, 4, 16, 16
    Cr = C // 2

    key = jax.random.PRNGKey(0)
    k_x, k_w1, k_w2, k_ws = jax.random.split(key, 4)

    x = jax.random.normal(k_x, (B, C, H, W), dtype=jnp.float32)
    lim1 = 1.0 / (C ** 0.5)   # Conv2d default init scale (fan_in = C)
    lim2 = 1.0 / (Cr ** 0.5)  # fan_in = C//2
    w1 = jax.random.uniform(k_w1, (Cr, C), minval=-lim1, maxval=lim1, dtype=jnp.float32)
    w2 = jax.random.uniform(k_w2, (C, Cr), minval=-lim2, maxval=lim2, dtype=jnp.float32)
    ws = jax.random.uniform(k_ws, (C,), minval=-lim1, maxval=lim1, dtype=jnp.float32)

    ref = scse_ref(x, w1, w2, ws)

    # f32 I/O: tight tolerance.
    out = jax.block_until_ready(scse_forward(x, w1, w2, ws))
    assert out.shape == (B, C, H, W)
    assert jnp.allclose(out, ref, atol=1e-4, rtol=1e-4), "f32 mismatch vs reference"

    # bf16 I/O smoke test (halves HBM traffic; op is bandwidth-bound). Looser
    # per-dtype tolerance since the MXU operands and the store are bf16.
    out_bf16 = jax.block_until_ready(
        scse_forward(x.astype(jnp.bfloat16), w1, w2, ws))
    assert out_bf16.shape == (B, C, H, W)
    assert jnp.allclose(out_bf16.astype(jnp.float32), ref, atol=5e-2, rtol=5e-2), \
        "bf16 mismatch vs reference"

    print("KERNEL_OK")
</pallas_src>

<mosaic_0001>
module attributes {stable_mosaic.version = 11 : i64} {
  func.func @_scse_kernel(%arg0: i32, %arg1: memref<1x2x4x256xf32, #tpu.memory_space<vmem>>, %arg2: memref<4x2xf32, #tpu.memory_space<vmem>>, %arg3: memref<2x4xf32, #tpu.memory_space<vmem>>, %arg4: memref<2x1x4xf32, #tpu.memory_space<vmem>>, %arg5: memref<1x2x4x256xf32, #tpu.memory_space<vmem>>) attributes {dimension_semantics = [#tpu.dimension_semantics<parallel>], iteration_bounds = array<i64: 1>, scalar_prefetch = 0 : i64, scratch_operands = 0 : i64, tpu.core_type = #tpu.core_type<tc>, window_params = [{transform_indices = @transform_0, window_bounds = array<i64: 1, 2, 4, 256>}, {pipeline_mode = #tpu.pipeline_mode<synchronous>, transform_indices = @transform_1, window_bounds = array<i64: 4, 2>}, {pipeline_mode = #tpu.pipeline_mode<synchronous>, transform_indices = @transform_2, window_bounds = array<i64: 2, 4>}, {pipeline_mode = #tpu.pipeline_mode<synchronous>, transform_indices = @transform_3, window_bounds = array<i64: 2, 1, 4>}, {transform_indices = @transform_4, window_bounds = array<i64: 1, 2, 4, 256>}]} {
    %c0 = arith.constant 0 : index
    %c0_0 = arith.constant 0 : index
    %c0_1 = arith.constant 0 : index
    %c0_2 = arith.constant 0 : index
    %0 = vector.load %arg1[%c0, %c0_0, %c0_1, %c0_2] : memref<1x2x4x256xf32, #tpu.memory_space<vmem>>, vector<1x2x4x256xf32>
    %1 = vector.shape_cast %0 : vector<1x2x4x256xf32> to vector<2x4x256xf32>
    %cst = arith.constant dense<0.000000e+00> : vector<2x4xf32>
    %2 = vector.multi_reduction <add>, %1, %cst [2] : vector<2x4x256xf32> to vector<2x4xf32>
    %cst_3 = arith.constant 3.906250e-03 : f32
    %3 = vector.broadcast %cst_3 : f32 to vector<2x4xf32>
    %4 = arith.mulf %2, %3 : vector<2x4xf32>
    %c0_4 = arith.constant 0 : index
    %c0_5 = arith.constant 0 : index
    %5 = vector.load %arg2[%c0_4, %c0_5] : memref<4x2xf32, #tpu.memory_space<vmem>>, vector<4x2xf32>
    %cst_6 = arith.constant dense<0.000000e+00> : vector<2x2xf32>
    %6 = tpu.matmul %4, %5, %cst_6 {dimension_numbers = #tpu.dot_dimension_numbers<[1], [0], [0], [1], [0, 0, 1, 1], [], []>} : vector<2x4xf32>, vector<4x2xf32>, vector<2x2xf32> -> vector<2x2xf32>
    %c0_7 = arith.constant 0 : index
    %c0_8 = arith.constant 0 : index
    %7 = vector.load %arg3[%c0_7, %c0_8] : memref<2x4xf32, #tpu.memory_space<vmem>>, vector<2x4xf32>
    %cst_9 = arith.constant dense<0.000000e+00> : vector<2x4xf32>
    %8 = tpu.matmul %6, %7, %cst_9 {dimension_numbers = #tpu.dot_dimension_numbers<[1], [0], [0], [1], [0, 0, 1, 1], [], []>} : vector<2x2xf32>, vector<2x4xf32>, vector<2x4xf32> -> vector<2x4xf32>
    %9 = arith.negf %8 : vector<2x4xf32>
    %10 = math.exp %9 : vector<2x4xf32>
    %cst_10 = arith.constant 1.000000e+00 : f32
    %11 = vector.broadcast %cst_10 : f32 to vector<2x4xf32>
    %12 = arith.addf %11, %10 : vector<2x4xf32>
    %13 = arith.divf %11, %12 : vector<2x4xf32>
    %c0_11 = arith.constant 0 : index
    %c0_12 = arith.constant 0 : index
    %c0_13 = arith.constant 0 : index
    %14 = vector.load %arg4[%c0_11, %c0_12, %c0_13] : memref<2x1x4xf32, #tpu.memory_space<vmem>>, vector<2x1x4xf32>
    "tpu.trace_start"() <{level = 10 : i32, message = "brc,bch->brh"}> : () -> ()
    %cst_14 = arith.constant dense<0.000000e+00> : vector<2x1x256xf32>
    %15 = tpu.matmul %14, %1, %cst_14 {dimension_numbers = #tpu.dot_dimension_numbers<[2], [1], [1], [2], [0, 0, 0, 1, 1, 2], [0], [0]>} : vector<2x1x4xf32>, vector<2x4x256xf32>, vector<2x1x256xf32> -> vector<2x1x256xf32>
    "tpu.trace_stop"() : () -> ()
    %16 = arith.negf %15 : vector<2x1x256xf32>
    %17 = math.exp %16 : vector<2x1x256xf32>
    %cst_15 = arith.constant 1.000000e+00 : f32
    %18 = vector.broadcast %cst_15 : f32 to vector<2x1x256xf32>
    %19 = arith.addf %18, %17 : vector<2x1x256xf32>
    %20 = arith.divf %18, %19 : vector<2x1x256xf32>
    %21 = vector.shape_cast %13 : vector<2x4xf32> to vector<2x4x1xf32>
    %22 = vector.broadcast %20 : vector<2x1x256xf32> to vector<2x4x256xf32>
    %23 = vector.broadcast %21 : vector<2x4x1xf32> to vector<2x4x256xf32>
    %24 = arith.addf %22, %23 : vector<2x4x256xf32>
    %25 = arith.mulf %1, %24 : vector<2x4x256xf32>
    %c0_16 = arith.constant 0 : index
    %c0_17 = arith.constant 0 : index
    %c0_18 = arith.constant 0 : index
    %c0_19 = arith.constant 0 : index
    %26 = vector.load %arg5[%c0_16, %c0_17, %c0_18, %c0_19] : memref<1x2x4x256xf32, #tpu.memory_space<vmem>>, vector<1x2x4x256xf32>
    %27 = vector.shape_cast %26 : vector<1x2x4x256xf32> to vector<2x4x256xf32>
    %28 = vector.shape_cast %25 : vector<2x4x256xf32> to vector<1x2x4x256xf32>
    tpu.vector_store %arg5[%c0_16, %c0_17, %c0_18, %c0_19], %28 {strides = array<i32>} : memref<1x2x4x256xf32, #tpu.memory_space<vmem>>, vector<1x2x4x256xf32>,
    return
  }
  func.func @transform_0(%arg0: i32) -> (i32, i32, i32, i32) {
    %c0_i32 = arith.constant 0 : i32
    %c0_i32_0 = arith.constant 0 : i32
    %c0_i32_1 = arith.constant 0 : i32
    %c0_i32_2 = arith.constant 0 : i32
    return %arg0, %c0_i32, %c0_i32_0, %c0_i32_1 : i32, i32, i32, i32
  }
  func.func @transform_1(%arg0: i32) -> (i32, i32) {
    %c0_i32 = arith.constant 0 : i32
    %c0_i32_0 = arith.constant 0 : i32
    %c0_i32_1 = arith.constant 0 : i32
    return %c0_i32, %c0_i32_0 : i32, i32
  }
  func.func @transform_2(%arg0: i32) -> (i32, i32) {
    %c0_i32 = arith.constant 0 : i32
    %c0_i32_0 = arith.constant 0 : i32
    %c0_i32_1 = arith.constant 0 : i32
    return %c0_i32, %c0_i32_0 : i32, i32
  }
  func.func @transform_3(%arg0: i32) -> (i32, i32, i32) {
    %c0_i32 = arith.constant 0 : i32
    %c0_i32_0 = arith.constant 0 : i32
    %c0_i32_1 = arith.constant 0 : i32
    %c0_i32_2 = arith.constant 0 : i32
    return %c0_i32, %c0_i32_0, %c0_i32_1 : i32, i32, i32
  }
  func.func @transform_4(%arg0: i32) -> (i32, i32, i32, i32) {
    %c0_i32 = arith.constant 0 : i32
    %c0_i32_0 = arith.constant 0 : i32
    %c0_i32_1 = arith.constant 0 : i32
    %c0_i32_2 = arith.constant 0 : i32
    return %arg0, %c0_i32, %c0_i32_0, %c0_i32_1 : i32, i32, i32, i32
  }
}

</mosaic_0001>

<bundles_post_ra>
// kernel: tpu_custom_call.1
= control target key start
LH: loop header
LB: loop body
LE: loop exit
PB: predicated region body
PF: predicated region fallthrough
CT: control target
= control target key end

     0   :  { %9 = vsyncpa [#allocation3], 0  ;;  %s564_s0 = inlined_call_operand.hbm [shape: f32[1,2,4,256], index: 0, kind: input, shape index: {}]   ;;  %s565_s1 = inlined_call_operand.vmem [shape: f32[4,2], index: 1, kind: input, shape index: {}]   ;;  %s566_s2 = inlined_call_operand.vmem [shape: f32[2,4], index: 2, kind: input, shape index: {}]   ;;  %s567_s3 = inlined_call_operand.vmem [shape: f32[2,1,4], index: 3, kind: input, shape index: {}]   ;;  %s568_s4 = inlined_call_operand.hbm [shape: f32[1,2,4,256], index: 4, kind: output, shape index: {}]  }
   0x1   :  { %10 = vsyncpa [#allocation4], 0  ;;  %s15_s17 = sshll.u32 %s564_s0, 4  ;;  %s473_s18 = smov [#allocation2]   ;;  %s16_s17 = int_to_ptr.hbm [resolvable:$true] %s15_s17 }
   0x2   :  { %s17_s19 = sshll.u32 %s473_s18, 4  ;;  %s474_s20 = smov 128   ;;  %s18_s19 = int_to_ptr.vmem [resolvable:$true] %s17_s19 }
   0x3   :  { %s475_s21 = smov 8  }
   0x4   :  { %23 = dma.hbm_to_vmem [thread:$0]  %s16_s17, 256, %s18_s19, [#allocation3], %s474_s20, %s474_s20, %s475_s21  }
   0x5   :  { %469 = dma.done.wait [#allocation3], 256  }
   0x6   :  { %470 = vsyncadd [#allocation3], 4294967040  ;;  %v508_v0 = vld [vmem:[#allocation2] sm:$0xff]  ;;  %v510_v1 = vld [vmem:[#allocation2 + $0x8] sm:$0xff]  ;;  %vm49_vm0 = vcmask 1043456   ;;  %v65_v14 = vlaneseq  ;;  %vm69_vm1 = vcmask 1041409  }
   0x7   :  { %38 = vst [vmem:[#allocation1] ss:$2 sm:$0xff] %v508_v0  ;;  %v62_v12 = vld [vmem:[%s565_s1] sm:$0xf]  ;;  %vm71_vm2 = vcmask 31744   ;;  %vm102_vm3 = vcmask 1041408  }
   0x8   :  { %42 = vst [vmem:[#allocation1 + $0x10] ss:$2 sm:$0xff] %v510_v1  ;;  %378 = vmatpush.msk.msra.mxu0 %vm49_vm0, %v62_v12  ;;  %v66_v15 = vand.u32 127, %v65_v14  ;;  %v97_v22 = vld [vmem:[%s566_s2] sm:$0x3]  ;;  %vm98_vm4 = vcmask 15360  }
   0x9   :  { %380 = vmatpush.msk.msra.mxu1 %vm102_vm3, %v97_v22  ;;  %v145_v24 = vld [vmem:[%s567_s3] sm:$0x1]  ;;  %v146_v28 = vld [vmem:[%s567_s3 + $0x1] sm:$0x1]  ;;  %v325_v30 = vshrl.u32 %v65_v14, 7  ;;  %s476_s3 = smov [#allocation5]  }
   0xa   :  { %s363_s27 = sshll.u32 %s476_s3, 4  ;;  %s365_s30 = sshll.u32 %s568_s4, 4  ;;  %s364_s27 = int_to_ptr.vmem [resolvable:$true] %s363_s27  ;;  %s366_s30 = int_to_ptr.hbm [resolvable:$true] %s365_s30 }
   0xb   :  { %399 = vset.pattern.permute.xlu1 %v325_v30  ;;  %400 = vset.pattern.permute.xlu0 %v325_v30 }
   0xe   :  { %v39_v2 = vld.sshfl [vmem:[#allocation1] sm:$0xff pattern:$0x75316420]  ;;  %v40_v3 = vld.sshfl [vmem:[#allocation1 + $0x8] sm:$0xff pattern:$0x75316420] }
   0xf   :  { %v50_v4 = vsel %vm49_vm0, %v39_v2, 0.0  ;;  %v51_v5 = vsel %vm49_vm0, %v40_v3, 0.0  ;;  %147 = vst [vmem:[#allocation1] ss:$2 sm:$0xff] %v508_v0 }
  0x10   :  { %v52_v6 = vadd.f32 %v51_v5, %v50_v4  ;;  %v43_v7 = vld.sshfl [vmem:[#allocation1 + $0x10] sm:$0xff pattern:$0x75316420]  ;;  %v44_v8 = vld.sshfl [vmem:[#allocation1 + $0x18] sm:$0xff pattern:$0x75316420] }
  0x11   :  { %v55_v9 = vsel %vm49_vm0, %v43_v7, 0.0  ;;  %v56_v10 = vsel %vm49_vm0, %v44_v8, 0.0 }
  0x12   :  { %53 = vadd.xlane.f32.xlu0 %v52_v6  ;;  %v57_v11 = vadd.f32 %v56_v10, %v55_v9 }
  0x16   :  { %v149_v23 = vld.sshfl [vmem:[#allocation1 + $0x8] sm:$0xff pattern:$0x75316420]  ;;  %v148_v25 = vld.sshfl [vmem:[#allocation1] sm:$0xff pattern:$0x75316420] }
  0x17   :  { %385 = vmatpush.msk.msra.mxu3 %vm49_vm0, %v149_v23  ;;  %383 = vmatpush.msk.msra.mxu2 %vm49_vm0, %v148_v25  ;;  %197 = vst [vmem:[#allocation1] ss:$2 sm:$0xff] %v510_v1 }
  0x18   :  { %386 = vmatmul.msk.f32.vlgmr.msra.gmra.mxu3 %vm71_vm2, %v145_v24  ;;  %384 = vmatmul.msk.f32.vlgmr.msra.gmra.mxu2 %vm71_vm2, %v145_v24 }
  0x1a   :  { %58 = vadd.xlane.f32.xlu0 %v57_v11 }
  0x1e   :  { %v199_v26 = vld.sshfl [vmem:[#allocation1 + $0x8] sm:$0xff pattern:$0x75316420]  ;;  %v198_v27 = vld.sshfl [vmem:[#allocation1] sm:$0xff pattern:$0x75316420] }
  0x1f   :  { %389 = vmatpush.msk.msrb.mxu1 %vm49_vm0, %v199_v26  ;;  %387 = vmatpush.msk.msrb.mxu0 %vm49_vm0, %v198_v27 }
  0x85   :  { %v54_v13 = vpop.xlane.xlu0 %53 }
  0x86   :  { %v60_v16 = vmul.f32 0.00390625, %v54_v13 }
  0x88   :  { %v67_v19 = vperm.slane %v60_v16, %v66_v15 }
  0x8d   :  { %v59_v17 = vpop.xlane.xlu0 %58 }
  0x8e   :  { %v61_v18 = vmul.f32 0.00390625, %v59_v17 }
  0x90   :  { %v68_v20 = vperm.slane %v61_v18, %v66_v15 }
  0x92   :  { %v70_v21 = vsel %vm69_vm1, %v68_v20, %v67_v19 }
  0x93   :  { %379 = vmatmul.msk.f32.vlgmr.msra.gmra.mxu0 %vm71_vm2, %v70_v21 }
  0x9b   :  { %388 = vmatmul.msk.f32.vlgmr.msrb.gmra.mxu0 %vm71_vm2, %v146_v28  ;;  %v194_v47 = vpop.f32.mrf.mxu3  ;;  %v174_v48 = vpop.f32.mrf.mxu2 }
  0x9c   :  { %v392_v49 = vmul.f32 -1.442695, %v194_v47  ;;  %v391_v50 = vmul.f32 -1.442695, %v174_v48 }
 0x110   :  { %v94_v29 = vpop.f32.mrf.mxu0 }
 0x111   :  { %381 = vmatmul.msk.f32.vlgmr.msra.gmra.mxu1 %vm98_vm4, %v94_v29 }
 0x118   :  { %v224_v52 = vpop.f32.mrf.mxu0 }
 0x119   :  { %390 = vmatmul.msk.f32.vlgmr.msrb.gmra.mxu1 %vm71_vm2, %v146_v28  ;;  %v393_v55 = vmul.f32 -1.442695, %v224_v52 }
 0x18e   :  { %v123_v31 = vpop.f32.mrf.mxu1 }
 0x18f   :  { %v382_v32 = vmul.f32 -1.442695, %v123_v31 }
 0x191   :  { %401 = vpow2.f32 %v382_v32 }
 0x196   :  { %v244_v51 = vpop.f32.mrf.mxu1 }
 0x197   :  { %v402_v33 = vpop.eup %401  ;;  %v394_v53 = vmul.f32 -1.442695, %v244_v51 }
 0x198   :  { %v129_v34 = vadd.f32 1.0, %v402_v33 }
 0x19a   :  { %403 = vrcp.f32 %v129_v34  ;;  %v141_v38 = vand.u32 2147483648, %v129_v34  ;;  %v139_v40 = vand.u32 2147483647, %v129_v34  ;;  %vm135_vm6 = vweird.f32 %v129_v34 }
 0x19b   :  { %405 = vpow2.f32 %v392_v49 }
 0x19c   :  { %v142_v42 = vor.u32 1.1754944e-38, %v141_v38  ;;  %vm140_vm8 = vcmp.eq.f32.partialorder %v139_v40, 8.507059e+37  ;;  %407 = vpow2.f32 %v391_v50 }
 0x19d   :  { %409 = vpow2.f32 %v394_v53 }
 0x19e   :  { %411 = vpow2.f32 %v393_v55 }
 0x1a0   :  { %v404_v35 = vpop.eup %403 }
 0x1a1   :  { %v131_v36 = vmul.f32 %v404_v35, %v129_v34  ;;  %vm136_vm5 = vweird.f32 %v404_v35  ;;  %v406_v54 = vpop.eup %405 }
 0x1a2   :  { %vm137_vm7 = vmor %vm135_vm6, %vm136_vm5  ;;  %v408_v56 = vpop.eup %407  ;;  %v260_v57 = vadd.f32 1.0, %v406_v54 }
 0x1a3   :  { %v132_v37 = vsub.f32 1.0, %v131_v36  ;;  %v259_v58 = vadd.f32 1.0, %v408_v56  ;;  %v410_v59 = vpop.eup %409 }
 0x1a4   :  { %413 = vrcp.f32 %v260_v57  ;;  %v412_v60 = vpop.eup %411  ;;  %v262_v61 = vadd.f32 1.0, %v410_v59  ;;  %vm283_vm9 = vweird.f32 %v260_v57  ;;  %v287_v13 = vand.u32 2147483647, %v260_v57 }
 0x1a5   :  { %v133_v39 = vmul.f32 %v404_v35, %v132_v37  ;;  %415 = vrcp.f32 %v259_v58  ;;  %v261_v63 = vadd.f32 1.0, %v412_v60  ;;  %v289_v14 = vand.u32 2147483648, %v260_v57 }
 0x1a6   :  { %417 = vrcp.f32 %v262_v61  ;;  %vm268_vm11 = vweird.f32 %v259_v58  ;;  %v272_v17 = vand.u32 2147483647, %v259_v58  ;;  %v274_v18 = vand.u32 2147483648, %v259_v58 }
 0x1a7   :  { %v134_v41 = vadd.f32 %v404_v35, %v133_v39  ;;  %419 = vrcp.f32 %v261_v63  ;;  %v290_v22 = vor.u32 1.1754944e-38, %v289_v14  ;;  %vm288_vm15 = vcmp.eq.f32.partialorder %v287_v13, 8.507059e+37 }
 0x1a8   :  { %vm273_vm1 = vcmp.eq.f32.partialorder %v272_v17, 8.507059e+37  ;;  %v275_v25 = vor.u32 1.1754944e-38, %v274_v18  ;;  %vm313_vm2 = vweird.f32 %v262_v61  ;;  %v319_v29 = vand.u32 2147483648, %v262_v61 }
 0x1a9   :  { %v138_v43 = vsel %vm137_vm7, %v404_v35, %v134_v41  ;;  %vm298_vm4 = vweird.f32 %v261_v63  ;;  %v317_v31 = vand.u32 2147483647, %v262_v61  ;;  %v304_v33 = vand.u32 2147483648, %v261_v63 }
 0x1aa   :  { %v143_v44 = vsel %vm140_vm8, %v142_v42, %v138_v43  ;;  %v414_v62 = vpop.eup %413  ;;  %v302_v37 = vand.u32 2147483647, %v261_v63  ;;  %v320_v39 = vor.u32 1.1754944e-38, %v319_v29 }
 0x1ab   :  { %v323_v45 = vperm.slane %v143_v44, 0  ;;  %v330_v46 = vperm.slane %v143_v44, 1  ;;  %v416_v2 = vpop.eup %415  ;;  %v279_v3 = vmul.f32 %v414_v62, %v260_v57  ;;  %vm284_vm10 = vweird.f32 %v414_v62 }
 0x1ac   :  { %v264_v4 = vmul.f32 %v416_v2, %v259_v58  ;;  %v418_v6 = vpop.eup %417  ;;  %vm269_vm12 = vweird.f32 %v416_v2  ;;  %vm285_vm13 = vmor %vm283_vm9, %vm284_vm10  ;;  %vm318_vm8 = vcmp.eq.f32.partialorder %v317_v31, 8.507059e+37  ;;  %v305_v43 = vor.u32 1.1754944e-38, %v304_v33 }
 0x1ad   :  { %328 = vperm.xlu1 %399, %v323_v45   ;;  %v280_v5 = vsub.f32 1.0, %v279_v3  ;;  %v420_v8 = vpop.eup %419  ;;  %v309_v10 = vmul.f32 %v418_v6, %v262_v61  ;;  %vm542_vm14 = vmor %vm268_vm11, %vm269_vm12  ;;  %vm314_vm3 = vweird.f32 %v418_v6  ;;  %vm303_vm9 = vcmp.eq.f32.partialorder %v302_v37, 8.507059e+37 }
 0x1ae   :  { %v265_v7 = vsub.f32 1.0, %v264_v4  ;;  %v294_v12 = vmul.f32 %v420_v8, %v261_v63  ;;  %vm299_vm5 = vweird.f32 %v420_v8  ;;  %vm548_vm6 = vmor %vm313_vm2, %vm314_vm3 }
 0x1af   :  { %v281_v9 = vmul.f32 %v414_v62, %v280_v5  ;;  %v310_v16 = vsub.f32 1.0, %v309_v10  ;;  %vm300_vm7 = vmor %vm298_vm4, %vm299_vm5 }
 0x1b0   :  { %v266_v11 = vmul.f32 %v416_v2, %v265_v7  ;;  %v295_v20 = vsub.f32 1.0, %v294_v12 }
 0x1b1   :  { %v282_v15 = vadd.f32 %v414_v62, %v281_v9  ;;  %v311_v24 = vmul.f32 %v418_v6, %v310_v16 }
 0x1b2   :  { %v267_v19 = vadd.f32 %v416_v2, %v266_v11  ;;  %v296_v27 = vmul.f32 %v420_v8, %v295_v20 }
 0x1b3   :  { %v286_v23 = vsel %vm285_vm13, %v414_v62, %v282_v15  ;;  %v312_v30 = vadd.f32 %v418_v6, %v311_v24 }
 0x1b4   :  { %v271_v26 = vsel %vm542_vm14, %v416_v2, %v267_v19  ;;  %v291_v28 = vsel %vm288_vm15, %v290_v22, %v286_v23  ;;  %v297_v36 = vadd.f32 %v420_v8, %v296_v27 }
 0x1b5   :  { %335 = vperm.xlu1 %399, %v330_v46   ;;  %v276_v32 = vsel %vm273_vm1, %v275_v25, %v271_v26  ;;  %v338_v35 = vperm.slane %v291_v28, 0  ;;  %v316_v42 = vsel %vm548_vm6, %v418_v6, %v312_v30 }
 0x1b6   :  { %v337_v40 = vperm.slane %v276_v32, 0  ;;  %v301_v46 = vsel %vm300_vm7, %v420_v8, %v297_v36  ;;  %v321_v47 = vsel %vm318_vm8, %v320_v39, %v316_v42 }
 0x1b7   :  { %v306_v50 = vsel %vm303_vm9, %v305_v43, %v301_v46  ;;  %v340_v51 = vperm.slane %v321_v47, 0 }
 0x1b8   :  { %v339_v53 = vperm.slane %v306_v50, 0 }
 0x21f   :  { %v329_v38 = vpop.permute.xlu1 %328 }
 0x220   :  { %v342_v41 = vadd.f32 %v338_v35, %v329_v38  ;;  %v341_v44 = vadd.f32 %v337_v40, %v329_v38 }
 0x222   :  { %v349_v45 = vrot.slane %v342_v41, 4 }
 0x224   :  { %v351_v48 = vsel %vm49_vm0, %v341_v44, %v349_v45 }
 0x225   :  { %v355_v49 = vmul.f32 %v351_v48, %v508_v0 }
 0x227   :  { %357 = vst [vmem:[#allocation5] sm:$0xff] %v355_v49  ;;  %v336_v52 = vpop.permute.xlu1 %335 }
 0x228   :  { %v344_v54 = vadd.f32 %v340_v51, %v336_v52  ;;  %v343_v55 = vadd.f32 %v339_v53, %v336_v52 }
 0x22a   :  { %v350_v56 = vrot.slane %v344_v54, 4 }
 0x22c   :  { %v352_v57 = vsel %vm49_vm0, %v343_v55, %v350_v56 }
 0x22d   :  { %v356_v58 = vmul.f32 %v352_v57, %v510_v1 }
 0x22f   :  { %358 = vst [vmem:[#allocation5 + $0x8] sm:$0xff] %v356_v58 }
 0x230   :  { %371 = dma.vmem_to_hbm [thread:$0]  %s364_s27, 256, %s366_s30, [#allocation4], %s474_s20, %s474_s20, %s475_s21  }
 0x231   :  { %471 = dma.done.wait [#allocation4], 256  }
 0x232   :  { %472 = vsyncadd [#allocation4], 4294967040 }
 0x233   :  { %376 = vsyncpa [#allocation3], 1 }
 0x234   :  { %377 = vsyncpa [#allocation4], 1 }

</bundles_post_ra>
